<compile_context>
chip_gen: v6e
topology: v6e:2x2x1
jax: 0.10.0
libtpu: 0.0.40
codegen_flags: <defaults>
</compile_context>

<pallas_src>
import functools

import jax
import jax.numpy as jnp
from jax import lax
from jax.experimental import pallas as pl
from jax.experimental.pallas import tpu as pltpu

EPS = 1e-7
NUM_CLASSES = 2
LANES = 128                     # lanes per vreg row
SPR = LANES // NUM_CLASSES      # samples per 128-lane row of the interleaved view


def _round_up(x, m):
    return ((x + m - 1) // m) * m


def _f1_partials_kernel(x_ref, y_ref, o_ref, *, nblocks, rem):
    """Per-block partial sums for the soft-F1 loss.

    x_ref: (br, 128) — raw (N, 2) logits viewed flat & lane-dense: lane 2k is
           x0 and lane 2k+1 is x1 of sample (row*64 + k).
    y_ref: (br, 64) int — labels, lane-dense, aligned with the compacted p1.
    o_ref: (1, 3, 8, 64) f32 — partials of [sum p1, sum y*p1, sum y].
    """
    i = pl.program_id(0)
    br = x_ref.shape[0]
    block_samples = br * SPR

    # Pairwise-difference matrix: d[:, k] = x[:, 2k+1] - x[:, 2k].
    # Doing the class-pair compaction on the (otherwise idle) MXU keeps p1
    # lane-dense so the sigmoid is one transcendental per sample.
    l_idx = lax.broadcasted_iota(jnp.int32, (LANES, SPR), 0)
    k_idx = lax.broadcasted_iota(jnp.int32, (LANES, SPR), 1)
    dmat = ((l_idx == 2 * k_idx + 1).astype(jnp.float32)
            - (l_idx == 2 * k_idx).astype(jnp.float32))

    x = x_ref[...].astype(jnp.float32)
    # Exact-in-bf16 high part + residual: the ±1 matmul result is f32-exact
    # even if the MXU rounds f32 operands to bf16 passes internally.
    x_hi = x.astype(jnp.bfloat16).astype(jnp.float32)
    x_lo = x - x_hi
    d = (jnp.dot(x_hi, dmat, preferred_element_type=jnp.float32)
         + jnp.dot(x_lo, dmat, preferred_element_type=jnp.float32))   # (br, 64)

    # 2-class softmax == sigmoid of the logit difference; tanh form = 1 EUP op.
    p1 = 0.5 * (jnp.tanh(0.5 * d) + 1.0)
    y = y_ref[...].astype(jnp.float32)

    def emit(p1v, yv):
        g = br // 8
        o_ref[0, 0] = p1v.reshape(g, 8, SPR).sum(axis=0)            # sum p1
        o_ref[0, 1] = (yv * p1v).reshape(g, 8, SPR).sum(axis=0)     # sum y*p1
        o_ref[0, 2] = yv.reshape(g, 8, SPR).sum(axis=0)             # sum y

    def emit_masked():
        # Only the last block can contain padded / out-of-bounds samples.
        # `rem` is a static Python int <= br*64, so no overflow concerns.
        s_idx = lax.broadcasted_iota(jnp.int32, (br, SPR), 0)
        c_idx = lax.broadcasted_iota(jnp.int32, (br, SPR), 1)
        valid = (s_idx * SPR + c_idx) < rem
        emit(jnp.where(valid, p1, 0.0), jnp.where(valid, y, 0.0))

    if rem >= block_samples:        # no padding anywhere: always unmasked
        emit(p1, y)
    elif nblocks == 1:              # single (masked) block
        emit_masked()
    else:
        @pl.when(i < nblocks - 1)
        def _():
            emit(p1, y)

        @pl.when(i == nblocks - 1)
        def _():
            emit_masked()


@functools.partial(jax.jit, static_argnames=("block_rows",))
def f1_loss(y_pred, y_true, *, block_rows=4096):
    """Soft-F1 loss (forward) matching the PyTorch F1_Loss module."""
    assert y_pred.ndim == 2 and y_pred.shape[1] == NUM_CLASSES
    assert y_true.ndim == 1 and y_true.shape[0] == y_pred.shape[0]
    assert block_rows % 8 == 0
    n = y_pred.shape[0]

    rows = pl.cdiv(n, SPR)                       # rows of the lane-dense views
    br = min(block_rows, _round_up(rows, 8))     # block row count (multiple of 8)
    rows_t = max(rows, br)                       # physical rows (> rows only for tiny n)
    nblocks = pl.cdiv(rows_t, br)                # partial last block is allowed
    rem = n - (nblocks - 1) * br * SPR           # valid samples in the last block

    # Lane-dense views of the *raw* inputs. These reshapes are free when
    # n % 64 == 0; only ragged sizes pay a minimal pad. No diff / one-hot /
    # label copies are materialized in HBM.
    x_flat = y_pred.reshape(-1)
    if x_flat.shape[0] != rows_t * LANES:
        x_flat = jnp.pad(x_flat, (0, rows_t * LANES - x_flat.shape[0]))
    x_view = x_flat.reshape(rows_t, LANES)

    y_flat = y_true
    if y_flat.shape[0] != rows_t * SPR:
        y_flat = jnp.pad(y_flat, (0, rows_t * SPR - y_flat.shape[0]))
    y_view = y_flat.reshape(rows_t, SPR)

    kernel = functools.partial(_f1_partials_kernel, nblocks=nblocks, rem=rem)

    partials = pl.pallas_call(
        kernel,
        out_shape=jax.ShapeDtypeStruct((nblocks, 3, 8, SPR), jnp.float32),
        grid_spec=pltpu.PrefetchScalarGridSpec(
            num_scalar_prefetch=0,
            grid=(nblocks,),
            in_specs=[
                pl.BlockSpec((br, LANES), lambda i: (i, 0)),
                pl.BlockSpec((br, SPR), lambda i: (i, 0)),
            ],
            out_specs=pl.BlockSpec((1, 3, 8, SPR), lambda i: (i, 0, 0, 0)),
        ),
        compiler_params=pltpu.CompilerParams(
            dimension_semantics=("parallel",)),
    )(x_view, y_view)

    # Combine the per-block partials and finish the O(1) soft-F1 algebra in JAX
    # (keeps the grid axis fully parallel / megacore-shardable on v7x).
    sums = jnp.sum(partials, axis=(0, 2, 3))          # [sum p1, sum y*p1, sum y]
    s_p1, s_yp, s_y = sums[0], sums[1], sums[2]
    nf = jnp.float32(n)

    # Confusion-matrix entries for both classes from three sums + n:
    a = s_yp                        # tp[1] == tn[0]
    b = s_p1 - s_yp                 # fp[1] == fn[0]
    c = s_y - s_yp                  # fn[1] == fp[0]
    d = nf - s_y - s_p1 + s_yp      # tp[0] == tn[1]

    def f1(t, fpos, fneg):
        prec = t / (t + fpos + EPS)
        rec = t / (t + fneg + EPS)
        f = 2.0 * prec * rec / (prec + rec + EPS)
        return jnp.clip(f, EPS, 1.0 - EPS)

    # mean over classes of 0.5*(f1_class1 + f1_class2) == 0.5*(f1(a,b,c)+f1(d,c,b))
    return 1.0 - 0.5 * (f1(a, b, c) + f1(d, c, b))


def _reference_f1_loss(y_pred, y_true):
    """Pure-JAX replica of the PyTorch F1_Loss.forward (for verification)."""
    y_oh = jax.nn.one_hot(y_true, NUM_CLASSES, dtype=jnp.float32)
    p = jax.nn.softmax(y_pred.astype(jnp.float32), axis=1)
    tp = jnp.sum(y_oh * p, axis=0)
    tn = jnp.sum((1 - y_oh) * (1 - p), axis=0)
    fp = jnp.sum((1 - y_oh) * p, axis=0)
    fn = jnp.sum(y_oh * (1 - p), axis=0)
    precision = tp / (tp + fp + EPS)
    recall = tp / (tp + fn + EPS)
    f1_c1 = jnp.clip(2 * precision * recall / (precision + recall + EPS),
                     EPS, 1 - EPS)
    precision = tn / (tn + fn + EPS)
    recall = tn / (tn + fp + EPS)
    f1_c2 = jnp.clip(2 * precision * recall / (precision + recall + EPS),
                     EPS, 1 - EPS)
    return 1.0 - jnp.mean(0.5 * (f1_c1 + f1_c2))


if __name__ == "__main__":
    key = jax.random.PRNGKey(0)
    ks = jax.random.split(key, 6)

    def check(batch, kp, kl, tol, **kw):
        y_pred = jax.random.normal(kp, (batch, NUM_CLASSES), dtype=jnp.float32)
        y_true = jax.random.randint(kl, (batch,), 0, NUM_CLASSES,
                                    dtype=jnp.int32)
        out = jax.block_until_ready(f1_loss(y_pred, y_true, **kw))
        ref = _reference_f1_loss(y_pred, y_true)
        assert jnp.abs(out - ref) < tol, (batch, out, ref)

    # Small batch from the module spec (single block, tail mask).
    check(16, ks[0], ks[1], 1e-5)
    # Ragged batch (minimal pad + tail mask).
    check(300, ks[2], ks[3], 1e-5)
    # Multi-block path with a partial last block (tiny block size on purpose).
    check(1056, ks[4], ks[5], 1e-4, block_rows=8)

    print("KERNEL_OK")
</pallas_src>

<mosaic_0001>
module attributes {stable_mosaic.version = 11 : i64} {
  func.func @_f1_partials_kernel(%arg0: i32, %arg1: memref<8x128xf32, #tpu.memory_space<vmem>>, %arg2: memref<8x64xi32, #tpu.memory_space<vmem>>, %arg3: memref<1x3x8x64xf32, #tpu.memory_space<vmem>>) attributes {dimension_semantics = [#tpu.dimension_semantics<parallel>], iteration_bounds = array<i64: 1>, scalar_prefetch = 0 : i64, scratch_operands = 0 : i64, tpu.core_type = #tpu.core_type<tc>, window_params = [{transform_indices = @transform_0, window_bounds = array<i64: 8, 128>}, {transform_indices = @transform_1, window_bounds = array<i64: 8, 64>}, {transform_indices = @transform_2, window_bounds = array<i64: 1, 3, 8, 64>}]} {
    %0 = tpu.iota {dimensions = array<i32: 0>} : vector<128x64xi32>
    %1 = tpu.iota {dimensions = array<i32: 1>} : vector<128x64xi32>
    %c2_i32 = arith.constant 2 : i32
    %2 = vector.broadcast %c2_i32 : i32 to vector<128x64xi32>
    %3 = arith.muli %2, %1 : vector<128x64xi32>
    %c1_i32 = arith.constant 1 : i32
    %4 = vector.broadcast %c1_i32 : i32 to vector<128x64xi32>
    %5 = arith.addi %3, %4 : vector<128x64xi32>
    %6 = arith.cmpi eq, %0, %5 : vector<128x64xi32>
    %7 = arith.extui %6 : vector<128x64xi1> to vector<128x64xi32>
    %8 = arith.sitofp %7 : vector<128x64xi32> to vector<128x64xf32>
    %c2_i32_0 = arith.constant 2 : i32
    %9 = vector.broadcast %c2_i32_0 : i32 to vector<128x64xi32>
    %10 = arith.muli %9, %1 : vector<128x64xi32>
    %11 = arith.cmpi eq, %0, %10 : vector<128x64xi32>
    %12 = arith.extui %11 : vector<128x64xi1> to vector<128x64xi32>
    %13 = arith.sitofp %12 : vector<128x64xi32> to vector<128x64xf32>
    %14 = arith.subf %8, %13 : vector<128x64xf32>
    %c0 = arith.constant 0 : index
    %c0_1 = arith.constant 0 : index
    %15 = vector.load %arg1[%c0, %c0_1] : memref<8x128xf32, #tpu.memory_space<vmem>>, vector<8x128xf32>
    %16 = arith.truncf %15 : vector<8x128xf32> to vector<8x128xbf16>
    %17 = arith.extf %16 : vector<8x128xbf16> to vector<8x128xf32>
    %18 = arith.subf %15, %17 : vector<8x128xf32>
    %cst = arith.constant dense<0.000000e+00> : vector<8x64xf32>
    %19 = tpu.matmul %17, %14, %cst {dimension_numbers = #tpu.dot_dimension_numbers<[1], [0], [0], [1], [0, 0, 1, 1], [], []>} : vector<8x128xf32>, vector<128x64xf32>, vector<8x64xf32> -> vector<8x64xf32>
    %cst_2 = arith.constant dense<0.000000e+00> : vector<8x64xf32>
    %20 = tpu.matmul %18, %14, %cst_2 {dimension_numbers = #tpu.dot_dimension_numbers<[1], [0], [0], [1], [0, 0, 1, 1], [], []>} : vector<8x128xf32>, vector<128x64xf32>, vector<8x64xf32> -> vector<8x64xf32>
    %21 = arith.addf %19, %20 : vector<8x64xf32>
    %cst_3 = arith.constant 5.000000e-01 : f32
    %22 = vector.broadcast %cst_3 : f32 to vector<8x64xf32>
    %23 = arith.mulf %22, %21 : vector<8x64xf32>
    %24 = math.tanh %23 : vector<8x64xf32>
    %cst_4 = arith.constant 1.000000e+00 : f32
    %25 = vector.broadcast %cst_4 : f32 to vector<8x64xf32>
    %26 = arith.addf %24, %25 : vector<8x64xf32>
    %cst_5 = arith.constant 5.000000e-01 : f32
    %27 = vector.broadcast %cst_5 : f32 to vector<8x64xf32>
    %28 = arith.mulf %27, %26 : vector<8x64xf32>
    %c0_6 = arith.constant 0 : index
    %c0_7 = arith.constant 0 : index
    %29 = vector.load %arg2[%c0_6, %c0_7] : memref<8x64xi32, #tpu.memory_space<vmem>>, vector<8x64xi32>
    %30 = arith.sitofp %29 : vector<8x64xi32> to vector<8x64xf32>
    %31 = tpu.iota {dimensions = array<i32: 0>} : vector<8x64xi32>
    %32 = tpu.iota {dimensions = array<i32: 1>} : vector<8x64xi32>
    %c64_i32 = arith.constant 64 : i32
    %33 = vector.broadcast %c64_i32 : i32 to vector<8x64xi32>
    %34 = arith.muli %31, %33 : vector<8x64xi32>
    %35 = arith.addi %34, %32 : vector<8x64xi32>
    %c16_i32 = arith.constant 16 : i32
    %36 = vector.broadcast %c16_i32 : i32 to vector<8x64xi32>
    %37 = arith.cmpi slt, %35, %36 : vector<8x64xi32>
    %cst_8 = arith.constant 0.000000e+00 : f32
    %38 = vector.broadcast %cst_8 : f32 to vector<8x64xf32>
    %39 = arith.select %37, %28, %38 : vector<8x64xi1>, vector<8x64xf32>
    %cst_9 = arith.constant 0.000000e+00 : f32
    %40 = vector.broadcast %cst_9 : f32 to vector<8x64xf32>
    %41 = arith.select %37, %30, %40 : vector<8x64xi1>, vector<8x64xf32>
    %42 = vector.shape_cast %39 : vector<8x64xf32> to vector<1x8x64xf32>
    %cst_10 = arith.constant dense<0.000000e+00> : vector<8x64xf32>
    %43 = vector.multi_reduction <add>, %42, %cst_10 [0] : vector<1x8x64xf32> to vector<8x64xf32>
    %c0_11 = arith.constant 0 : index
    %c0_12 = arith.constant 0 : index
    %c0_13 = arith.constant 0 : index
    %c0_14 = arith.constant 0 : index
    %44 = vector.load %arg3[%c0_11, %c0_12, %c0_13, %c0_14] : memref<1x3x8x64xf32, #tpu.memory_space<vmem>>, vector<1x1x8x64xf32>
    %45 = vector.shape_cast %44 : vector<1x1x8x64xf32> to vector<8x64xf32>
    %46 = vector.shape_cast %43 : vector<8x64xf32> to vector<1x1x8x64xf32>
    tpu.vector_store %arg3[%c0_11, %c0_12, %c0_13, %c0_14], %46 {strides = array<i32>} : memref<1x3x8x64xf32, #tpu.memory_space<vmem>>, vector<1x1x8x64xf32>,
    %47 = arith.mulf %41, %39 : vector<8x64xf32>
    %48 = vector.shape_cast %47 : vector<8x64xf32> to vector<1x8x64xf32>
    %cst_15 = arith.constant dense<0.000000e+00> : vector<8x64xf32>
    %49 = vector.multi_reduction <add>, %48, %cst_15 [0] : vector<1x8x64xf32> to vector<8x64xf32>
    %c0_16 = arith.constant 0 : index
    %c1 = arith.constant 1 : index
    %c0_17 = arith.constant 0 : index
    %c0_18 = arith.constant 0 : index
    %50 = vector.load %arg3[%c0_16, %c1, %c0_17, %c0_18] : memref<1x3x8x64xf32, #tpu.memory_space<vmem>>, vector<1x1x8x64xf32>
    %51 = vector.shape_cast %50 : vector<1x1x8x64xf32> to vector<8x64xf32>
    %52 = vector.shape_cast %49 : vector<8x64xf32> to vector<1x1x8x64xf32>
    tpu.vector_store %arg3[%c0_16, %c1, %c0_17, %c0_18], %52 {strides = array<i32>} : memref<1x3x8x64xf32, #tpu.memory_space<vmem>>, vector<1x1x8x64xf32>,
    %53 = vector.shape_cast %41 : vector<8x64xf32> to vector<1x8x64xf32>
    %cst_19 = arith.constant dense<0.000000e+00> : vector<8x64xf32>
    %54 = vector.multi_reduction <add>, %53, %cst_19 [0] : vector<1x8x64xf32> to vector<8x64xf32>
    %c0_20 = arith.constant 0 : index
    %c2 = arith.constant 2 : index
    %c0_21 = arith.constant 0 : index
    %c0_22 = arith.constant 0 : index
    %55 = vector.load %arg3[%c0_20, %c2, %c0_21, %c0_22] : memref<1x3x8x64xf32, #tpu.memory_space<vmem>>, vector<1x1x8x64xf32>
    %56 = vector.shape_cast %55 : vector<1x1x8x64xf32> to vector<8x64xf32>
    %57 = vector.shape_cast %54 : vector<8x64xf32> to vector<1x1x8x64xf32>
    tpu.vector_store %arg3[%c0_20, %c2, %c0_21, %c0_22], %57 {strides = array<i32>} : memref<1x3x8x64xf32, #tpu.memory_space<vmem>>, vector<1x1x8x64xf32>,
    return
  }
  func.func @transform_0(%arg0: i32) -> (i32, i32) {
    %c0_i32 = arith.constant 0 : i32
    %c0_i32_0 = arith.constant 0 : i32
    return %arg0, %c0_i32 : i32, i32
  }
  func.func @transform_1(%arg0: i32) -> (i32, i32) {
    %c0_i32 = arith.constant 0 : i32
    %c0_i32_0 = arith.constant 0 : i32
    return %arg0, %c0_i32 : i32, i32
  }
  func.func @transform_2(%arg0: i32) -> (i32, i32, i32, i32) {
    %c0_i32 = arith.constant 0 : i32
    %c0_i32_0 = arith.constant 0 : i32
    %c0_i32_1 = arith.constant 0 : i32
    %c0_i32_2 = arith.constant 0 : i32
    return %arg0, %c0_i32, %c0_i32_0, %c0_i32_1 : i32, i32, i32, i32
  }
}

</mosaic_0001>

<bundles_post_ra>
// kernel: f1_loss.1
= control target key start
LH: loop header
LB: loop body
LE: loop exit
PB: predicated region body
PF: predicated region fallthrough
CT: control target
= control target key end

     0   :  { %v11_v0 = vlaneseq  ;;  %v455_v1 = vmov 0.0   ;;  %vm456_vm0 = vmmov 0   ;;  %s622_s0 = inlined_call_operand.vmem [shape: f32[8,128], index: 0, kind: input, shape index: {}]   ;;  %s623_s1 = inlined_call_operand.vmem [shape: s32[8,64], index: 1, kind: input, shape index: {}]   ;;  %s624_s2 = inlined_call_operand.vmem [shape: f32[1,3,8,64], index: 2, kind: output, shape index: {}]  }
   0x1   :  { %381 = vmatprep.subr.mxu0 %v455_v1  ;;  %416 = vmatprep.subr.mxu1 %v455_v1  ;;  %v144_v56 = vld [vmem:[%s622_s0] sm:$0xff] }
   0x2   :  { %v474_v2 = vshrl.u32 %v11_v0, 7  ;;  %v476_v3 = vand.u32 127, %v11_v0  ;;  %413 = vmatprep.mubr.msk.f32.mxu0 %vm456_vm0, %v455_v1  ;;  %448 = vmatprep.mubr.msk.f32.mxu1 %vm456_vm0, %v455_v1  ;;  %v145_v62 = vpack.c.bf16 %v144_v56, %v144_v56 }
   0x4   :  { %v27_v4 = vadd.s32 120, %v474_v2  ;;  %v482_v5 = vmul.u32 2, %v476_v3  ;;  %v26_v6 = vadd.s32 112, %v474_v2  ;;  %v25_v7 = vadd.s32 104, %v474_v2 }
   0x5   :  { %v24_v8 = vadd.s32 96, %v474_v2  ;;  %v23_v9 = vadd.s32 88, %v474_v2  ;;  %v22_v13 = vadd.s32 80, %v474_v2  ;;  %v21_v20 = vadd.s32 72, %v474_v2 }
   0x6   :  { %v489_v10 = vadd.s32 1, %v482_v5  ;;  %vm95_vm1 = vcmp.eq.s32.totalorder %v27_v4, %v482_v5  ;;  %vm94_vm2 = vcmp.eq.s32.totalorder %v26_v6, %v482_v5  ;;  %vm93_vm3 = vcmp.eq.s32.totalorder %v25_v7, %v482_v5 }
   0x7   :  { %v344_v11 = vsel %vm95_vm1, 1.0, %v455_v1  ;;  %v343_v12 = vsel %vm94_vm2, 1.0, %v455_v1  ;;  %vm92_vm4 = vcmp.eq.s32.totalorder %v24_v8, %v482_v5  ;;  %v342_v17 = vsel %vm93_vm3, 1.0, %v455_v1 }
   0x8   :  { %vm47_vm5 = vcmp.eq.s32.totalorder %v27_v4, %v489_v10  ;;  %vm46_vm6 = vcmp.eq.s32.totalorder %v26_v6, %v489_v10  ;;  %vm45_vm7 = vcmp.eq.s32.totalorder %v25_v7, %v489_v10  ;;  %vm44_vm8 = vcmp.eq.s32.totalorder %v24_v8, %v489_v10 }
   0x9   :  { %v328_v14 = vsel %vm47_vm5, 1.0, %v455_v1  ;;  %v327_v15 = vsel %vm46_vm6, 1.0, %v455_v1  ;;  %v326_v16 = vsel %vm45_vm7, 1.0, %v455_v1  ;;  %v325_v21 = vsel %vm44_vm8, 1.0, %v455_v1 }
   0xa   :  { %v143_v18 = vsub.f32 %v328_v14, %v344_v11  ;;  %v142_v19 = vsub.f32 %v327_v15, %v343_v12  ;;  %v341_v22 = vsel %vm92_vm4, 1.0, %v455_v1  ;;  %vm43_vm9 = vcmp.eq.s32.totalorder %v23_v9, %v489_v10 }
   0xb   :  { %vm91_vm10 = vcmp.eq.s32.totalorder %v23_v9, %v482_v5  ;;  %v141_v23 = vsub.f32 %v326_v16, %v342_v17  ;;  %vm42_vm11 = vcmp.eq.s32.totalorder %v22_v13, %v489_v10  ;;  %vm90_vm12 = vcmp.eq.s32.totalorder %v22_v13, %v482_v5  ;;  %v292_v13 = vld [vmem:[%s623_s1] sm:$0xff] }
   0xc   :  { %382 = vmatpush3.msra.mxu0 %v143_v18  ;;  %417 = vmatpush3.msra.mxu1 %v143_v18  ;;  %v324_v24 = vsel %vm43_vm9, 1.0, %v455_v1  ;;  %v340_v25 = vsel %vm91_vm10, 1.0, %v455_v1  ;;  %v140_v26 = vsub.f32 %v325_v21, %v341_v22  ;;  %vm41_vm13 = vcmp.eq.s32.totalorder %v21_v20, %v489_v10 }
   0xd   :  { %383 = vmatprep.subr.mxu0 %v455_v1  ;;  %418 = vmatprep.subr.mxu1 %v455_v1  ;;  %vm89_vm14 = vcmp.eq.s32.totalorder %v21_v20, %v482_v5  ;;  %v20_v27 = vadd.s32 64, %v474_v2  ;;  %v323_v28 = vsel %vm42_vm11, 1.0, %v455_v1  ;;  %v339_v29 = vsel %vm90_vm12, 1.0, %v455_v1 }
   0xe   :  { %384 = vmatpush3.msra.mxu0 %v142_v19  ;;  %419 = vmatpush3.msra.mxu1 %v142_v19  ;;  %v19_v30 = vadd.s32 56, %v474_v2  ;;  %v139_v31 = vsub.f32 %v324_v24, %v340_v25  ;;  %v18_v32 = vadd.s32 48, %v474_v2  ;;  %v322_v33 = vsel %vm41_vm13, 1.0, %v455_v1 }
   0xf   :  { %385 = vmatprep.subr.mxu0 %v455_v1  ;;  %420 = vmatprep.subr.mxu1 %v455_v1  ;;  %vm40_vm15 = vcmp.eq.s32.totalorder %v20_v27, %v489_v10  ;;  %vm88_vm0 = vcmp.eq.s32.totalorder %v20_v27, %v482_v5  ;;  %v338_v34 = vsel %vm89_vm14, 1.0, %v455_v1  ;;  %v138_v35 = vsub.f32 %v323_v28, %v339_v29 }
  0x10   :  { %386 = vmatpush3.msra.mxu0 %v141_v23  ;;  %421 = vmatpush3.msra.mxu1 %v141_v23  ;;  %vm39_vm1 = vcmp.eq.s32.totalorder %v19_v30, %v489_v10  ;;  %vm87_vm2 = vcmp.eq.s32.totalorder %v19_v30, %v482_v5  ;;  %v17_v36 = vadd.s32 40, %v474_v2  ;;  %v321_v37 = vsel %vm40_vm15, 1.0, %v455_v1 }
  0x11   :  { %387 = vmatprep.subr.mxu0 %v455_v1  ;;  %422 = vmatprep.subr.mxu1 %v455_v1  ;;  %v337_v38 = vsel %vm88_vm0, 1.0, %v455_v1  ;;  %v137_v39 = vsub.f32 %v322_v33, %v338_v34  ;;  %vm38_vm3 = vcmp.eq.s32.totalorder %v18_v32, %v489_v10  ;;  %vm86_vm4 = vcmp.eq.s32.totalorder %v18_v32, %v482_v5 }
  0x12   :  { %388 = vmatpush3.msra.mxu0 %v140_v26  ;;  %423 = vmatpush3.msra.mxu1 %v140_v26  ;;  %v16_v40 = vadd.s32 32, %v474_v2  ;;  %v320_v41 = vsel %vm39_vm1, 1.0, %v455_v1  ;;  %v336_v42 = vsel %vm87_vm2, 1.0, %v455_v1  ;;  %v136_v43 = vsub.f32 %v321_v37, %v337_v38 }
  0x13   :  { %389 = vmatprep.subr.mxu0 %v455_v1  ;;  %424 = vmatprep.subr.mxu1 %v455_v1  ;;  %vm37_vm5 = vcmp.eq.s32.totalorder %v17_v36, %v489_v10  ;;  %vm85_vm6 = vcmp.eq.s32.totalorder %v17_v36, %v482_v5  ;;  %v15_v44 = vadd.s32 24, %v474_v2  ;;  %v319_v45 = vsel %vm38_vm3, 1.0, %v455_v1 }
  0x14   :  { %390 = vmatpush3.msra.mxu0 %v139_v31  ;;  %425 = vmatpush3.msra.mxu1 %v139_v31  ;;  %v335_v46 = vsel %vm86_vm4, 1.0, %v455_v1  ;;  %v135_v47 = vsub.f32 %v320_v41, %v336_v42  ;;  %vm36_vm7 = vcmp.eq.s32.totalorder %v16_v40, %v489_v10  ;;  %vm84_vm8 = vcmp.eq.s32.totalorder %v16_v40, %v482_v5 }
  0x15   :  { %391 = vmatprep.subr.mxu0 %v455_v1  ;;  %426 = vmatprep.subr.mxu1 %v455_v1  ;;  %v14_v48 = vadd.s32 16, %v474_v2  ;;  %v318_v49 = vsel %vm37_vm5, 1.0, %v455_v1  ;;  %v334_v50 = vsel %vm85_vm6, 1.0, %v455_v1  ;;  %v134_v51 = vsub.f32 %v319_v45, %v335_v46 }
  0x16   :  { %392 = vmatpush3.msra.mxu0 %v138_v35  ;;  %427 = vmatpush3.msra.mxu1 %v138_v35  ;;  %vm35_vm9 = vcmp.eq.s32.totalorder %v15_v44, %v489_v10  ;;  %vm83_vm10 = vcmp.eq.s32.totalorder %v15_v44, %v482_v5  ;;  %v13_v52 = vadd.s32 8, %v474_v2  ;;  %v317_v53 = vsel %vm36_vm7, 1.0, %v455_v1 }
  0x17   :  { %393 = vmatprep.subr.mxu0 %v455_v1  ;;  %428 = vmatprep.subr.mxu1 %v455_v1  ;;  %v333_v54 = vsel %vm84_vm8, 1.0, %v455_v1  ;;  %v133_v55 = vsub.f32 %v318_v49, %v334_v50  ;;  %vm34_vm11 = vcmp.eq.s32.totalorder %v14_v48, %v489_v10  ;;  %vm82_vm12 = vcmp.eq.s32.totalorder %v14_v48, %v482_v5 }
  0x18   :  { %394 = vmatpush3.msra.mxu0 %v137_v39  ;;  %429 = vmatpush3.msra.mxu1 %v137_v39  ;;  %v316_v57 = vsel %vm35_vm9, 1.0, %v455_v1  ;;  %v332_v58 = vsel %vm83_vm10, 1.0, %v455_v1  ;;  %v132_v59 = vsub.f32 %v317_v53, %v333_v54  ;;  %vm33_vm13 = vcmp.eq.s32.totalorder %v13_v52, %v489_v10 }
  0x19   :  { %395 = vmatprep.subr.mxu0 %v455_v1  ;;  %430 = vmatprep.subr.mxu1 %v455_v1  ;;  %vm81_vm14 = vcmp.eq.s32.totalorder %v13_v52, %v482_v5  ;;  %v315_v60 = vsel %vm34_vm11, 1.0, %v455_v1  ;;  %v331_v61 = vsel %vm82_vm12, 1.0, %v455_v1  ;;  %v131_v63 = vsub.f32 %v316_v57, %v332_v58 }
  0x1a   :  { %396 = vmatpush3.msra.mxu0 %v136_v43  ;;  %431 = vmatpush3.msra.mxu1 %v136_v43  ;;  %vm32_vm15 = vcmp.eq.s32.totalorder %v474_v2, %v489_v10  ;;  %vm80_vm0 = vcmp.eq.s32.totalorder %v474_v2, %v482_v5  ;;  %v314_v0 = vsel %vm33_vm13, 1.0, %v455_v1  ;;  %v330_v4 = vsel %vm81_vm14, 1.0, %v455_v1 }
  0x1b   :  { %397 = vmatprep.subr.mxu0 %v455_v1  ;;  %432 = vmatprep.subr.mxu1 %v455_v1  ;;  %v130_v6 = vsub.f32 %v315_v60, %v331_v61  ;;  %v313_v7 = vsel %vm32_vm15, 1.0, %v455_v1  ;;  %v329_v8 = vsel %vm80_vm0, 1.0, %v455_v1  ;;  %v146_v5 = vunpack.c.l.bf16 %v145_v62 }
  0x1c   :  { %398 = vmatpush3.msra.mxu0 %v135_v47  ;;  %433 = vmatpush3.msra.mxu1 %v135_v47  ;;  %v129_v9 = vsub.f32 %v314_v0, %v330_v4  ;;  %v128_v10 = vsub.f32 %v313_v7, %v329_v8  ;;  %v294_v12 = vmul.u32 64, %v474_v2  ;;  %v293_v15 = vcvt.s32.f32 %v292_v13 }
  0x1d   :  { %399 = vmatprep.subr.mxu0 %v455_v1  ;;  %434 = vmatprep.subr.mxu1 %v455_v1  ;;  %v147_v11 = vsub.f32 %v144_v56, %v146_v5  ;;  %vm300_vm2 = vcmask 523264  }
  0x1e   :  { %400 = vmatpush3.msra.mxu0 %v134_v51  ;;  %435 = vmatpush3.msra.mxu1 %v134_v51  ;;  %v295_v14 = vadd.s32 %v294_v12, %v476_v3 }
  0x1f   :  { %401 = vmatprep.subr.mxu0 %v455_v1  ;;  %436 = vmatprep.subr.mxu1 %v455_v1 }
  0x20   :  { %402 = vmatpush3.msra.mxu0 %v133_v55  ;;  %437 = vmatpush3.msra.mxu1 %v133_v55  ;;  %vm296_vm1 = vcmp.lt.s32.totalorder %v295_v14, 16 }
  0x21   :  { %403 = vmatprep.subr.mxu0 %v455_v1  ;;  %438 = vmatprep.subr.mxu1 %v455_v1  ;;  %v298_v16 = vsel %vm296_vm1, %v293_v15, 0.0 }
  0x22   :  { %404 = vmatpush3.msra.mxu0 %v132_v59  ;;  %439 = vmatpush3.msra.mxu1 %v132_v59  ;;  %346 = vst.msk [vmem:[%s624_s2 + $0x10] sm:$0xff] %vm300_vm2, %v298_v16 }
  0x23   :  { %405 = vmatprep.subr.mxu0 %v455_v1  ;;  %440 = vmatprep.subr.mxu1 %v455_v1 }
  0x24   :  { %406 = vmatpush3.msra.mxu0 %v131_v63  ;;  %441 = vmatpush3.msra.mxu1 %v131_v63 }
  0x25   :  { %407 = vmatprep.subr.mxu0 %v455_v1  ;;  %442 = vmatprep.subr.mxu1 %v455_v1 }
  0x26   :  { %408 = vmatpush3.msra.mxu0 %v130_v6  ;;  %443 = vmatpush3.msra.mxu1 %v130_v6 }
  0x27   :  { %409 = vmatprep.subr.mxu0 %v455_v1  ;;  %444 = vmatprep.subr.mxu1 %v455_v1 }
  0x28   :  { %410 = vmatpush3.msra.mxu0 %v129_v9  ;;  %445 = vmatpush3.msra.mxu1 %v129_v9 }
  0x29   :  { %411 = vmatprep.subr.mxu0 %v455_v1  ;;  %446 = vmatprep.subr.mxu1 %v455_v1 }
  0x2a   :  { %412 = vmatpush3.msra.mxu0 %v128_v10  ;;  %447 = vmatpush3.msra.mxu1 %v128_v10 }
  0x2b   :  { %414 = vmatmul.mubr.f32.vlgmr.msra.gmra.mxu0 %v147_v11  ;;  %449 = vmatmul.mubr.f32.vlgmr.msra.gmra.mxu1 %v146_v5 }
  0xeb   :  { %v214_v1 = vpop.f32.mrf.mxu0  ;;  %v284_v17 = vpop.f32.mrf.mxu1 }
  0xec   :  { %v285_v18 = vadd.f32 %v284_v17, %v214_v1 }
  0xed   :  { %v415_v19 = vpop.f32.mrf.mxu0  ;;  %v450_v20 = vpop.f32.mrf.mxu1 }
  0xee   :  { %v288_v2 = vmul.f32 0.5, %v285_v18 }
  0xf0   :  { %453 = vtanh.f32 %v288_v2 }
  0xfd   :  { %v454_v21 = vpop.eup %453 }
  0xfe   :  { %v290_v22 = vadd.f32 1.0, %v454_v21 }
 0x100   :  { %v291_v23 = vmul.f32 0.5, %v290_v22 }
 0x102   :  { %v297_v24 = vsel %vm296_vm1, %v291_v23, 0.0 }
 0x103   :  { %301 = vst.msk [vmem:[%s624_s2] sm:$0xff] %vm300_vm2, %v297_v24  ;;  %v302_v3 = vmul.f32 %v298_v16, %v297_v24 }
 0x105   :  { %345 = vst.msk [vmem:[%s624_s2 + $0x8] sm:$0xff] %vm300_vm2, %v302_v3 }

</bundles_post_ra>
